<compile_context>
chip_gen: v7x
topology: tpu7x:2x2x1
jax: 0.10.0
libtpu: 0.0.40
codegen_flags: <defaults>
</compile_context>

<pallas_src>
import jax
import jax.numpy as jnp
import numpy as np
from jax.experimental import pallas as pl
from jax.experimental.pallas import tpu as pltpu


def _round_up(n, m):
    return ((n + m - 1) // m) * m


def emk_kernel(x_ref, w_ref, b_ref, o_ref):
    # x_ref: (tile_bt, C)      -- bt rows, C channels
    # w_ref: (C, C*F)          -- block-diagonal packed weight (resident)
    # b_ref: (1, C*F)          -- flattened bias (resident)
    # o_ref: (tile_bt, C*F)    -- lane-dense output tile
    o_ref[...] = (
        jnp.dot(x_ref[...], w_ref[...], preferred_element_type=jnp.float32)
        + b_ref[...]
    ).astype(o_ref.dtype)


def evidence_machine_kernel(x, c_weight, c_bias, *, tile_bt=1024):
    """x: (B, T, C) f32; c_weight/c_bias: (C, F). Returns (B, T, C, F)."""
    B, T, C = x.shape
    Cw, F = c_weight.shape
    assert Cw == C
    CF = C * F
    BT = B * T

    # --- pack parameters into lane-dense form (done once, outside the kernel)
    # W_sel[c, c2*F + f] = c_weight[c, f] if c2 == c else 0  (block diagonal)
    eye = jnp.eye(C, dtype=c_weight.dtype)
    w_sel = (eye[:, :, None] * c_weight[None, :, :]).reshape(C, CF)
    b_flat = c_bias.reshape(1, CF)

    # --- tile selection: big tiles, rounded to sublane multiple (8), with
    #     padding so any B*T works (no divisibility requirement).
    tile = max(8, min(int(tile_bt), _round_up(BT, 8)))
    tile = _round_up(tile, 8)
    BT_pad = _round_up(BT, tile)

    x_flat = x.reshape(BT, C)
    if BT_pad != BT:
        x_flat = jnp.pad(x_flat, ((0, BT_pad - BT), (0, 0)))

    # --- explicit scoped-VMEM budget: 2x double-buffered in/out tiles + params
    bytes_per = jnp.dtype(x.dtype).itemsize
    vmem_need = (2 * tile * C + 2 * tile * CF + 2 * (C * CF + CF)) * bytes_per
    vmem_limit = int(min(max(2 * vmem_need, 4 << 20), 100 << 20))

    out_flat = pl.pallas_call(
        emk_kernel,
        out_shape=jax.ShapeDtypeStruct((BT_pad, CF), x.dtype),
        grid=(BT_pad // tile,),
        in_specs=[
            pl.BlockSpec((tile, C), lambda i: (i, 0)),    # x tile over bt
            pl.BlockSpec((C, CF), lambda i: (0, 0)),      # packed weight, resident
            pl.BlockSpec((1, CF), lambda i: (0, 0)),      # packed bias, resident
        ],
        out_specs=pl.BlockSpec((tile, CF), lambda i: (i, 0)),
        compiler_params=pltpu.CompilerParams(
            dimension_semantics=("parallel",),
            vmem_limit_bytes=vmem_limit,
        ),
    )(x_flat, w_sel, b_flat)

    if BT_pad != BT:
        out_flat = out_flat[:BT]
    return out_flat.reshape(B, T, C, F)


# TODO(synk): non-default activations ('linear'/'mlp'/'attn'/'relu'/...) of the
# module are not exercised here (module default activation=None makes them
# inactive, so the forward pass above is the full default semantics).

if __name__ == "__main__":
    # Module config: C channels, F exponent -> feature dim 2**F
    C = 4
    F_exp = 5
    F = 2 ** F_exp          # 32  (C*F = 128 -> lane-dense output)
    B, T = 2, 8

    key = jax.random.PRNGKey(0)
    k_x, k_w, k_b, k_x2 = jax.random.split(key, 4)

    # Deterministic "randn"-style parameter init (synthetic, no checkpoint).
    c_weight = jax.random.normal(k_w, (C, F), dtype=jnp.float32)
    c_bias = jax.random.normal(k_b, (C, F), dtype=jnp.float32)
    x = jax.random.normal(k_x, (B, T, C), dtype=jnp.float32)

    out = evidence_machine_kernel(x, c_weight, c_bias)
    out = jax.block_until_ready(out)

    # Pure-JAX reference for correctness.
    ref = jnp.einsum('btc,cf->btcf', x, c_weight) + c_bias
    np.testing.assert_allclose(np.asarray(out), np.asarray(ref),
                               rtol=1e-5, atol=1e-5)

    # Second check: non-divisible B*T exercises the padded-tail path.
    B2, T2 = 3, 11           # BT = 33 -> padded to a multiple of 8
    x2 = jax.random.normal(k_x2, (B2, T2, C), dtype=jnp.float32)
    out2 = jax.block_until_ready(evidence_machine_kernel(x2, c_weight, c_bias))
    ref2 = jnp.einsum('btc,cf->btcf', x2, c_weight) + c_bias
    np.testing.assert_allclose(np.asarray(out2), np.asarray(ref2),
                               rtol=1e-5, atol=1e-5)

    print("KERNEL_OK")
</pallas_src>

<mosaic_0001>
module attributes {stable_mosaic.version = 11 : i64} {
  func.func @emk_kernel(%arg0: i32, %arg1: memref<16x4xf32, #tpu.memory_space<vmem>>, %arg2: memref<4x128xf32, #tpu.memory_space<vmem>>, %arg3: memref<1x128xf32, #tpu.memory_space<vmem>>, %arg4: memref<16x128xf32, #tpu.memory_space<vmem>>) attributes {dimension_semantics = [#tpu.dimension_semantics<parallel>], iteration_bounds = array<i64: 1>, scalar_prefetch = 0 : i64, scratch_operands = 0 : i64, tpu.core_type = #tpu.core_type<tc>, window_params = [{transform_indices = @transform_0, window_bounds = array<i64: 16, 4>}, {pipeline_mode = #tpu.pipeline_mode<synchronous>, transform_indices = @transform_1, window_bounds = array<i64: 4, 128>}, {pipeline_mode = #tpu.pipeline_mode<synchronous>, transform_indices = @transform_2, window_bounds = array<i64: 1, 128>}, {transform_indices = @transform_3, window_bounds = array<i64: 16, 128>}]} {
    %c0 = arith.constant 0 : index
    %c0_0 = arith.constant 0 : index
    %0 = vector.load %arg1[%c0, %c0_0] : memref<16x4xf32, #tpu.memory_space<vmem>>, vector<16x4xf32>
    %c0_1 = arith.constant 0 : index
    %c0_2 = arith.constant 0 : index
    %1 = vector.load %arg2[%c0_1, %c0_2] : memref<4x128xf32, #tpu.memory_space<vmem>>, vector<4x128xf32>
    %cst = arith.constant dense<0.000000e+00> : vector<16x128xf32>
    %2 = tpu.matmul %0, %1, %cst {dimension_numbers = #tpu.dot_dimension_numbers<[1], [0], [0], [1], [0, 0, 1, 1], [], []>} : vector<16x4xf32>, vector<4x128xf32>, vector<16x128xf32> -> vector<16x128xf32>
    %c0_3 = arith.constant 0 : index
    %c0_4 = arith.constant 0 : index
    %3 = vector.load %arg3[%c0_3, %c0_4] : memref<1x128xf32, #tpu.memory_space<vmem>>, vector<1x128xf32>
    %4 = vector.broadcast %3 : vector<1x128xf32> to vector<16x128xf32>
    %5 = arith.addf %2, %4 : vector<16x128xf32>
    %c0_5 = arith.constant 0 : index
    %c0_6 = arith.constant 0 : index
    %6 = vector.load %arg4[%c0_5, %c0_6] : memref<16x128xf32, #tpu.memory_space<vmem>>, vector<16x128xf32>
    tpu.vector_store %arg4[%c0_5, %c0_6], %5 {strides = array<i32>} : memref<16x128xf32, #tpu.memory_space<vmem>>, vector<16x128xf32>,
    return
  }
  func.func @transform_0(%arg0: i32) -> (i32, i32) {
    %c0_i32 = arith.constant 0 : i32
    %c0_i32_0 = arith.constant 0 : i32
    return %arg0, %c0_i32 : i32, i32
  }
  func.func @transform_1(%arg0: i32) -> (i32, i32) {
    %c0_i32 = arith.constant 0 : i32
    %c0_i32_0 = arith.constant 0 : i32
    %c0_i32_1 = arith.constant 0 : i32
    return %c0_i32, %c0_i32_0 : i32, i32
  }
  func.func @transform_2(%arg0: i32) -> (i32, i32) {
    %c0_i32 = arith.constant 0 : i32
    %c0_i32_0 = arith.constant 0 : i32
    %c0_i32_1 = arith.constant 0 : i32
    return %c0_i32, %c0_i32_0 : i32, i32
  }
  func.func @transform_3(%arg0: i32) -> (i32, i32) {
    %c0_i32 = arith.constant 0 : i32
    %c0_i32_0 = arith.constant 0 : i32
    return %arg0, %c0_i32 : i32, i32
  }
}

</mosaic_0001>

<bundles_post_ra>
// kernel: tpu_custom_call.1
= control target key start
LH: loop header
LB: loop body
LE: loop exit
PB: predicated region body
PF: predicated region fallthrough
CT: control target
= control target key end

     0   :  { %vm32_vm0 = vcmask 1043456   ;;  %vm25_vm1 = vcmask 31744   ;;  %s215_s0 = inlined_call_operand.vmem [shape: f32[16,4], index: 0, kind: input, shape index: {}]   ;;  %s216_s1 = inlined_call_operand.vmem [shape: f32[4,128], index: 1, kind: input, shape index: {}]   ;;  %s217_s2 = inlined_call_operand.vmem [shape: f32[1,128], index: 2, kind: input, shape index: {}]   ;;  %s218_s3 = inlined_call_operand.hbm [shape: f32[16,128], index: 3, kind: output, shape index: {}]  }
   0x1   :  { %v17_v0 = vld [vmem:[%s216_s1] sm:$0xf]  ;;  %v16_v2 = vld [vmem:[%s215_s0 + $0x8] sm:$0xff] }
   0x2   :  { %v15_v1 = vld [vmem:[%s215_s0] sm:$0xff]  ;;  %136 = vmatprep.subr.msk.mxu0 %vm32_vm0, %v17_v0 }
   0x3   :  { %138 = vmatprep.mubr.msk.f32.mxu0 %vm25_vm1, %v15_v1 }
   0x4   :  { %8 = vsyncpa [#allocation3], 0  ;;  %137 = vmatpush3.msk.msra.mxu0 %vm32_vm0, %v17_v0  ;;  %v129_v3 = vld [vmem:[%s217_s2] ss:$0 sm:$0xff]  ;;  %s168_s1 = smov [#allocation2]  }
   0x5   :  { %139 = vmatmul.mubr.msk.f32.vlgmr.msra.gmra.mrb[0].mxu0 %vm25_vm1, %v16_v2  ;;  %s118_s20 = sshll.u32 %s168_s1, 4  ;;  %s119_s20 = int_to_ptr.vmem [resolvable:$true] %s118_s20 }
   0x6   :  { %s144_s21 = scalar_lea.vmem %s119_s20, 256  ;;  %p149_p1 = scmp.lt.s32.totalorder %s119_s20, %s119_s20 }
   0x7   :  { %p145_p0 = scmp.ne.s32.totalorder %s119_s20, %s144_s21  ;;  %p150_p2 = scmp.lt.s32.totalorder %s144_s21, %s144_s21 }
   0x9   :  { %p151_p3 = por %p150_p2, %p149_p1 }
   0xb   :  { %p152_p4 = pnand %p151_p3, %p145_p0 }
  0xd8   :  { %v140_v4 = vpop.f32.mrb[0].mxu0 }
  0xd9   :  { %v108_v5 = vadd.f32 %v140_v4, %v129_v3  ;;  %v102_v6 = vpop.f32.mrb[1].mxu0 }
  0xda   :  { %v103_v7 = vadd.f32 %v129_v3, %v102_v6 }
  0xdb   :  { %112 = vst [vmem:[#allocation2 + $0x8] sm:$0xff] %v108_v5 }
  0xdc   :  { %111 = vst [vmem:[#allocation2] sm:$0xff] %v103_v7 }
  0xdd   :  { %155 = shalt.err (!%p152_p4)
}
  0xde   :  { %s156_s2 = scalar_lea.hbm %s218_s3, 256 }
  0xdf   :  { %p157_p5 = scmp.ne.s32.totalorder %s218_s3, %s156_s2  ;;  %p160_p6 = scmp.lt.u32.totalorder %s156_s2, %s218_s3 }
  0xe1   :  { %p162_p7 = pnand %p160_p6, %p157_p5 }
  0xe3   :  { %165 = shalt.err (!%p162_p7)
}
  0xe4   :  { %s169_s27 = smov 128   ;;  %s170_s28 = smov 8  }
  0xe5   :  { %124 = dma.vmem_to_hbm [thread:$0]  %s119_s20, 256, %s218_s3, [#allocation3], %s169_s27, %s169_s27, %s170_s28  }
  0xe6   :  { %166 = dma.done.wait [#allocation3], 256  }
  0xe7   :  { %167 = vsyncadd [#allocation3], 4294967040 }
  0xe8   :  { %128 = vsyncpa [#allocation3], 1 }

</bundles_post_ra>
